<compile_context>
chip_gen: v6e
topology: v6e:2x2x1
jax: 0.10.0
libtpu: 0.0.40
codegen_flags: <defaults>
</compile_context>

<pallas_src>
import jax
import jax.numpy as jnp
from jax.experimental import pallas as pl
from jax.experimental.pallas import tpu as pltpu


def _round_up(x: int, m: int) -> int:
    return ((x + m - 1) // m) * m


def _embed_onehot_kernel(idx_ref, table_ref, out_ref, acc_ref):
    """Fill one (TQ, D) output tile, reducing over vocab tiles (inner grid axis)."""
    k = pl.program_id(1)              # vocab-tile index (reduction axis)
    tq = out_ref.shape[0]
    tv = table_ref.shape[0]

    @pl.when(k == 0)
    def _():
        acc_ref[...] = jnp.zeros_like(acc_ref)

    idx = idx_ref[...]                                            # (TQ, 1) int32
    vocab_ids = jax.lax.broadcasted_iota(jnp.int32, (tq, tv), 1) + k * tv
    onehot = (vocab_ids == idx).astype(table_ref.dtype)           # (TQ, tv)
    # Gather as a matmul on the otherwise-idle MXU.
    acc_ref[...] += jnp.dot(onehot, table_ref[...],
                            preferred_element_type=jnp.float32)

    @pl.when(k == pl.num_programs(1) - 1)
    def _():
        out_ref[...] = acc_ref[...].astype(out_ref.dtype)


def embedding_forward(table: jax.Array, X: jax.Array, *,
                      tq: int = 256,
                      table_tile_budget_bytes: int = 8 << 20) -> jax.Array:
    """table: [V, D] float32, X: int [B, S] -> [B, S, D] float32."""
    B, S = X.shape
    V, D = table.shape
    N = B * S

    # --- token tiling: pad N up to a multiple of TQ; padded slots get id -1
    #     (matches no row -> zero output) and are sliced off afterwards.
    n_pad = _round_up(max(N, 1), tq)
    flat_idx = jnp.full((n_pad, 1), -1, dtype=jnp.int32)
    flat_idx = flat_idx.at[:N, 0].set(X.reshape(N).astype(jnp.int32))

    # --- vocab tiling: keep the whole table resident in VMEM when it fits the
    #     per-tile budget (double-buffered tile + (TQ,D) out + acc stay well
    #     under the default 32 MiB scoped VMEM limit, also on v7x's 64 MiB
    #     physical VMEM); otherwise tile the vocab axis and accumulate.
    row_bytes = D * jnp.dtype(table.dtype).itemsize
    tv_max = max(8, (table_tile_budget_bytes // row_bytes) // 8 * 8)
    tv = V if V <= tv_max else tv_max
    v_pad = _round_up(V, tv)
    if v_pad != V:
        table = jnp.concatenate(
            [table, jnp.zeros((v_pad - V, D), table.dtype)], axis=0)

    grid = (n_pad // tq, v_pad // tv)   # (token tiles, vocab tiles); reduction last

    out_flat = pl.pallas_call(
        _embed_onehot_kernel,
        out_shape=jax.ShapeDtypeStruct((n_pad, D), table.dtype),
        grid_spec=pltpu.PrefetchScalarGridSpec(
            num_scalar_prefetch=0,
            grid=grid,
            in_specs=[
                # (TQ, 1) block of token ids for this token tile.
                pl.BlockSpec((tq, 1), lambda i, k: (i, 0)),
                # Vocab tile of the table; constant over the token axis, so it
                # is DMA'd once per vocab tile and stays resident in VMEM.
                pl.BlockSpec((tv, D), lambda i, k: (k, 0)),
            ],
            out_specs=pl.BlockSpec((tq, D), lambda i, k: (i, 0)),
            scratch_shapes=[pltpu.VMEM((tq, D), jnp.float32)],
        ),
        compiler_params=pltpu.CompilerParams(
            dimension_semantics=("parallel", "arbitrary"),
        ),
    )(flat_idx, table)

    return out_flat[:N].reshape(B, S, D)


def init_embedding_table(key, vocab_size: int, input_dim: int, pad: int) -> jax.Array:
    # nn.Embedding init: weight ~ N(0, 1); row `padding_idx` zeroed.
    w = jax.random.normal(key, (vocab_size, input_dim), dtype=jnp.float32)
    w = w.at[pad].set(0.0)
    return w


if __name__ == "__main__":
    # Small shapes consistent with the module's forward.
    vocab_size = 32
    input_dim = 128      # lane-dense D
    pad = 0
    B, S = 2, 8

    key = jax.random.PRNGKey(0)
    k_w, k_x = jax.random.split(key)

    table = init_embedding_table(k_w, vocab_size, input_dim, pad)
    X = jax.random.randint(k_x, (B, S), 0, vocab_size, dtype=jnp.int32)

    out = embedding_forward(table, X)
    out = jax.block_until_ready(out)

    # Reference check against plain gather (same semantics as nn.Embedding fwd).
    ref = jnp.take(table, X, axis=0)
    assert out.shape == (B, S, input_dim)
    assert jnp.allclose(out, ref), "mismatch vs reference gather"
    # padding rows must be exactly zero
    assert jnp.all(jnp.where((X == pad)[..., None], out == 0.0, True))

    print("KERNEL_OK")
</pallas_src>

<mosaic_0001>
module attributes {stable_mosaic.version = 11 : i64} {
  func.func @_embed_onehot_kernel(%arg0: i32, %arg1: i32, %arg2: memref<256x1xi32, #tpu.memory_space<vmem>>, %arg3: memref<32x128xf32, #tpu.memory_space<vmem>>, %arg4: memref<256x128xf32, #tpu.memory_space<vmem>>, %arg5: memref<256x128xf32, #tpu.memory_space<vmem>>) attributes {dimension_semantics = [#tpu.dimension_semantics<parallel>, #tpu.dimension_semantics<arbitrary>], iteration_bounds = array<i64: 1, 1>, scalar_prefetch = 0 : i64, scratch_operands = 1 : i64, tpu.core_type = #tpu.core_type<tc>, window_params = [{transform_indices = @transform_0, window_bounds = array<i64: 256, 1>}, {transform_indices = @transform_1, window_bounds = array<i64: 32, 128>}, {transform_indices = @transform_2, window_bounds = array<i64: 256, 128>}]} {
    %c0_i32 = arith.constant 0 : i32
    %0 = arith.cmpi eq, %arg1, %c0_i32 : i32
    %1 = arith.extui %0 : i1 to i32
    %c0_i32_0 = arith.constant 0 : i32
    %2 = arith.cmpi ne, %1, %c0_i32_0 : i32
    scf.if %2 {
      %cst_10 = arith.constant 0.000000e+00 : f32
      %20 = vector.broadcast %cst_10 : f32 to vector<256x128xf32>
      %c0_11 = arith.constant 0 : index
      %c0_12 = arith.constant 0 : index
      %21 = vector.load %arg5[%c0_11, %c0_12] : memref<256x128xf32, #tpu.memory_space<vmem>>, vector<256x128xf32>
      tpu.vector_store %arg5[%c0_11, %c0_12], %20 {strides = array<i32>} : memref<256x128xf32, #tpu.memory_space<vmem>>, vector<256x128xf32>,
    } else {
    }
    %c0 = arith.constant 0 : index
    %c0_1 = arith.constant 0 : index
    %3 = vector.load %arg2[%c0, %c0_1] : memref<256x1xi32, #tpu.memory_space<vmem>>, vector<256x1xi32>
    %4 = tpu.iota {dimensions = array<i32: 1>} : vector<256x32xi32>
    %c32_i32 = arith.constant 32 : i32
    %5 = arith.muli %arg1, %c32_i32 : i32
    %6 = vector.broadcast %5 : i32 to vector<256x32xi32>
    %7 = arith.addi %4, %6 : vector<256x32xi32>
    %8 = vector.broadcast %3 : vector<256x1xi32> to vector<256x32xi32>
    %9 = arith.cmpi eq, %7, %8 : vector<256x32xi32>
    %10 = arith.extui %9 : vector<256x32xi1> to vector<256x32xi32>
    %11 = arith.sitofp %10 : vector<256x32xi32> to vector<256x32xf32>
    %c0_2 = arith.constant 0 : index
    %c0_3 = arith.constant 0 : index
    %12 = vector.load %arg5[%c0_2, %c0_3] : memref<256x128xf32, #tpu.memory_space<vmem>>, vector<256x128xf32>
    %c0_4 = arith.constant 0 : index
    %c0_5 = arith.constant 0 : index
    %13 = vector.load %arg3[%c0_4, %c0_5] : memref<32x128xf32, #tpu.memory_space<vmem>>, vector<32x128xf32>
    %cst = arith.constant dense<0.000000e+00> : vector<256x128xf32>
    %14 = tpu.matmul %11, %13, %cst {dimension_numbers = #tpu.dot_dimension_numbers<[1], [0], [0], [1], [0, 0, 1, 1], [], []>} : vector<256x32xf32>, vector<32x128xf32>, vector<256x128xf32> -> vector<256x128xf32>
    %15 = arith.addf %12, %14 : vector<256x128xf32>
    %c0_6 = arith.constant 0 : index
    %c0_7 = arith.constant 0 : index
    %16 = vector.load %arg5[%c0_6, %c0_7] : memref<256x128xf32, #tpu.memory_space<vmem>>, vector<256x128xf32>
    tpu.vector_store %arg5[%c0_6, %c0_7], %15 {strides = array<i32>} : memref<256x128xf32, #tpu.memory_space<vmem>>, vector<256x128xf32>,
    %c0_i32_8 = arith.constant 0 : i32
    %17 = arith.cmpi eq, %arg1, %c0_i32_8 : i32
    %18 = arith.extui %17 : i1 to i32
    %c0_i32_9 = arith.constant 0 : i32
    %19 = arith.cmpi ne, %18, %c0_i32_9 : i32
    scf.if %19 {
      %c0_10 = arith.constant 0 : index
      %c0_11 = arith.constant 0 : index
      %20 = vector.load %arg5[%c0_10, %c0_11] : memref<256x128xf32, #tpu.memory_space<vmem>>, vector<256x128xf32>
      %c0_12 = arith.constant 0 : index
      %c0_13 = arith.constant 0 : index
      %21 = vector.load %arg4[%c0_12, %c0_13] : memref<256x128xf32, #tpu.memory_space<vmem>>, vector<256x128xf32>
      tpu.vector_store %arg4[%c0_12, %c0_13], %20 {strides = array<i32>} : memref<256x128xf32, #tpu.memory_space<vmem>>, vector<256x128xf32>,
    } else {
    }
    return
  }
  func.func @transform_0(%arg0: i32, %arg1: i32) -> (i32, i32) {
    %c0_i32 = arith.constant 0 : i32
    %c0_i32_0 = arith.constant 0 : i32
    return %arg0, %c0_i32 : i32, i32
  }
  func.func @transform_1(%arg0: i32, %arg1: i32) -> (i32, i32) {
    %c0_i32 = arith.constant 0 : i32
    %c0_i32_0 = arith.constant 0 : i32
    return %arg1, %c0_i32 : i32, i32
  }
  func.func @transform_2(%arg0: i32, %arg1: i32) -> (i32, i32) {
    %c0_i32 = arith.constant 0 : i32
    %c0_i32_0 = arith.constant 0 : i32
    return %arg0, %c0_i32 : i32, i32
  }
}

</mosaic_0001>

<bundles_post_ra>
// kernel: tpu_custom_call.1
= control target key start
LH: loop header
LB: loop body
LE: loop exit
PB: predicated region body
PF: predicated region fallthrough
CT: control target
= control target key end

     0   :  { %v975_v2 = vmov 0   ;;  %s1204_s0 = inlined_call_operand.vmem [shape: s32[256,1], index: 0, kind: input, shape index: {}]   ;;  %s1205_s1 = inlined_call_operand.vmem [shape: f32[32,128], index: 1, kind: input, shape index: {}]   ;;  %s1206_s2 = inlined_call_operand.hbm [shape: f32[256,128], index: 2, kind: output, shape index: {}]  }
   0x1   :  { %v49_v0 = vld [vmem:[%s1204_s0 + $0x8] sm:$0xff]  ;;  %v48_v1 = vld [vmem:[%s1204_s0] sm:$0xff]  ;;  %952 = vset.pattern.permute.xlu1 %v975_v2  ;;  %951 = vset.pattern.permute.xlu0 %v975_v2  ;;  %v66_v5 = vld [vmem:[%s1204_s0 + $0x90] sm:$0xff] }
   0x2   :  { %89 = vperm.xlu1 %952, %v49_v0   ;;  %86 = vperm.xlu0 %951, %v48_v1   ;;  %v65_v3 = vld [vmem:[%s1204_s0 + $0x88] sm:$0xff]  ;;  %v64_v4 = vld [vmem:[%s1204_s0 + $0x80] sm:$0xff]  ;;  %v50_v6 = vld [vmem:[%s1204_s0 + $0x10] sm:$0xff] }
   0x3   :  { %v312_v7 = vld [vmem:[%s1205_s1 + $0x18] sm:$0xff]  ;;  %v311_v10 = vld [vmem:[%s1205_s1 + $0x10] sm:$0xff] }
   0x4   :  { %v67_v8 = vld [vmem:[%s1204_s0 + $0x98] sm:$0xff]  ;;  %882 = vmatprep.subr.mxu0 %v312_v7  ;;  %938 = vmatprep.subr.mxu1 %v312_v7 }
   0x5   :  { %v51_v9 = vld [vmem:[%s1204_s0 + $0x18] sm:$0xff]  ;;  %883 = vmatpush3.msra.mxu0 %v312_v7  ;;  %942 = vmatpush3.msra.mxu1 %v312_v7 }
   0x6   :  { %137 = vperm.xlu1 %952, %v65_v3   ;;  %134 = vperm.xlu0 %951, %v64_v4  }
   0xa   :  { %140 = vperm.xlu1 %952, %v66_v5   ;;  %92 = vperm.xlu0 %951, %v50_v6  }
   0xb   :  { %7 = vsyncpa [#allocation4], 0  ;;  %884 = vmatprep.subr.mxu0 %v311_v10  ;;  %v310_v11 = vld [vmem:[%s1205_s1 + $0x8] sm:$0xff]  ;;  %939 = vmatprep.subr.mxu1 %v311_v10  ;;  %v68_v12 = vld [vmem:[%s1204_s0 + $0xa0] sm:$0xff]  ;;  %v80_v37 = vlaneseq  ;;  %vm313_vm0 = vcmask 261120   ;;  %v976_v41 = vmov 0.0  }
   0xc   :  { %v52_v13 = vld [vmem:[%s1204_s0 + $0x20] sm:$0xff]  ;;  %885 = vmatpush3.msra.mxu0 %v311_v10  ;;  %943 = vmatpush3.msra.mxu1 %v311_v10  ;;  %v69_v15 = vld [vmem:[%s1204_s0 + $0xa8] sm:$0xff]  ;;  %v70_v17 = vld [vmem:[%s1204_s0 + $0xb0] sm:$0xff] }
   0xd   :  { %886 = vmatprep.subr.mxu0 %v310_v11  ;;  %v309_v14 = vld [vmem:[%s1205_s1] sm:$0xff]  ;;  %940 = vmatprep.subr.mxu1 %v310_v11  ;;  %v53_v16 = vld [vmem:[%s1204_s0 + $0x28] sm:$0xff]  ;;  %v54_v18 = vld [vmem:[%s1204_s0 + $0x30] sm:$0xff]  ;;  %v1103_v38 = vand.u32 127, %v80_v37 }
   0xe   :  { %143 = vperm.xlu1 %952, %v67_v8   ;;  %95 = vperm.xlu0 %951, %v51_v9   ;;  %v71_v19 = vld [vmem:[%s1204_s0 + $0xb8] sm:$0xff]  ;;  %v72_v21 = vld [vmem:[%s1204_s0 + $0xc0] sm:$0xff]  ;;  %v73_v23 = vld [vmem:[%s1204_s0 + $0xc8] sm:$0xff] }
   0xf   :  { %887 = vmatpush3.msra.mxu0 %v310_v11  ;;  %944 = vmatpush3.msra.mxu1 %v310_v11  ;;  %v55_v20 = vld [vmem:[%s1204_s0 + $0x38] sm:$0xff]  ;;  %v56_v22 = vld [vmem:[%s1204_s0 + $0x40] sm:$0xff]  ;;  %v57_v24 = vld [vmem:[%s1204_s0 + $0x48] sm:$0xff] }
  0x10   :  { %888 = vmatprep.subr.mxu0 %v309_v14  ;;  %941 = vmatprep.subr.mxu1 %v309_v14  ;;  %v74_v25 = vld [vmem:[%s1204_s0 + $0xd0] sm:$0xff]  ;;  %v75_v27 = vld [vmem:[%s1204_s0 + $0xd8] sm:$0xff]  ;;  %v76_v29 = vld [vmem:[%s1204_s0 + $0xe0] sm:$0xff] }
  0x11   :  { %889 = vmatpush3.msra.mxu0 %v309_v14  ;;  %945 = vmatpush3.msra.mxu1 %v309_v14  ;;  %v58_v26 = vld [vmem:[%s1204_s0 + $0x50] sm:$0xff]  ;;  %v59_v28 = vld [vmem:[%s1204_s0 + $0x58] sm:$0xff]  ;;  %v60_v30 = vld [vmem:[%s1204_s0 + $0x60] sm:$0xff] }
  0x12   :  { %146 = vperm.xlu1 %952, %v68_v12   ;;  %98 = vperm.xlu0 %951, %v52_v13   ;;  %v77_v31 = vld [vmem:[%s1204_s0 + $0xe8] sm:$0xff]  ;;  %v78_v33 = vld [vmem:[%s1204_s0 + $0xf0] sm:$0xff]  ;;  %v79_v35 = vld [vmem:[%s1204_s0 + $0xf8] sm:$0xff] }
  0x13   :  { %v61_v32 = vld [vmem:[%s1204_s0 + $0x68] sm:$0xff]  ;;  %v62_v34 = vld [vmem:[%s1204_s0 + $0x70] sm:$0xff]  ;;  %v63_v36 = vld [vmem:[%s1204_s0 + $0x78] sm:$0xff]  ;;  %s977_s0 = smov [#allocation3]  }
  0x14   :  { %s771_s23 = sshll.u32 %s977_s0, 4  ;;  %s772_s23 = int_to_ptr.vmem [resolvable:$true] %s771_s23 }
  0x15   :  { %s953_s24 = scalar_lea.vmem %s772_s23, 4096  ;;  %p958_p1 = scmp.lt.s32.totalorder %s772_s23, %s772_s23 }
  0x16   :  { %149 = vperm.xlu1 %952, %v69_v15   ;;  %101 = vperm.xlu0 %951, %v53_v16   ;;  %p954_p0 = scmp.ne.s32.totalorder %s772_s23, %s953_s24  ;;  %p959_p2 = scmp.lt.s32.totalorder %s953_s24, %s953_s24 }
  0x18   :  { %p960_p3 = por %p959_p2, %p958_p1 }
  0x1a   :  { %152 = vperm.xlu1 %952, %v70_v17   ;;  %104 = vperm.xlu0 %951, %v54_v18   ;;  %p961_p4 = pnand %p960_p3, %p954_p0 }
  0x1e   :  { %155 = vperm.xlu1 %952, %v71_v19   ;;  %107 = vperm.xlu0 %951, %v55_v20  }
  0x22   :  { %158 = vperm.xlu1 %952, %v72_v21   ;;  %110 = vperm.xlu0 %951, %v56_v22  }
  0x26   :  { %161 = vperm.xlu1 %952, %v73_v23   ;;  %113 = vperm.xlu0 %951, %v57_v24  }
  0x2a   :  { %164 = vperm.xlu1 %952, %v74_v25   ;;  %116 = vperm.xlu0 %951, %v58_v26  }
  0x2e   :  { %167 = vperm.xlu1 %952, %v75_v27   ;;  %119 = vperm.xlu0 %951, %v59_v28  }
  0x32   :  { %170 = vperm.xlu1 %952, %v76_v29   ;;  %122 = vperm.xlu0 %951, %v60_v30  }
  0x36   :  { %173 = vperm.xlu1 %952, %v77_v31   ;;  %125 = vperm.xlu0 %951, %v61_v32  }
  0x3a   :  { %176 = vperm.xlu1 %952, %v78_v33   ;;  %128 = vperm.xlu0 %951, %v62_v34  }
  0x3e   :  { %179 = vperm.xlu1 %952, %v79_v35   ;;  %131 = vperm.xlu0 %951, %v63_v36  }
  0x7d   :  { %v90_v39 = vpop.permute.xlu1 %89  ;;  %v87_v40 = vpop.permute.xlu0 %86 }
  0x7e   :  { %vm182_vm1 = vcmp.eq.s32.totalorder %v1103_v38, %v90_v39  ;;  %vm181_vm2 = vcmp.eq.s32.totalorder %v1103_v38, %v87_v40 }
  0x7f   :  { %v783_v42 = vsel %vm182_vm1, 1.0, %v976_v41  ;;  %v782_v43 = vsel %vm181_vm2, 1.0, %v976_v41 }
  0x80   :  { %890 = vmatprep.mubr.msk.f32.mxu0 %vm313_vm0, %v782_v43 }
  0x81   :  { %v138_v44 = vpop.permute.xlu1 %137  ;;  %891 = vmatmul.mubr.msk.f32.vlgmr.msra.gmra.mxu0 %vm313_vm0, %v783_v42  ;;  %v135_v45 = vpop.permute.xlu0 %134 }
  0x82   :  { %vm198_vm3 = vcmp.eq.s32.totalorder %v1103_v38, %v138_v44  ;;  %vm197_vm4 = vcmp.eq.s32.totalorder %v1103_v38, %v135_v45 }
  0x83   :  { %v799_v46 = vsel %vm198_vm3, 1.0, %v976_v41  ;;  %v798_v47 = vsel %vm197_vm4, 1.0, %v976_v41 }
  0x84   :  { %914 = vmatprep.mubr.msk.f32.mxu1 %vm313_vm0, %v798_v47 }
  0x85   :  { %v141_v48 = vpop.permute.xlu1 %140  ;;  %915 = vmatmul.mubr.msk.f32.vlgmr.msra.gmra.mxu1 %vm313_vm0, %v799_v46  ;;  %v93_v49 = vpop.permute.xlu0 %92 }
  0x86   :  { %vm199_vm5 = vcmp.eq.s32.totalorder %v1103_v38, %v141_v48  ;;  %vm183_vm6 = vcmp.eq.s32.totalorder %v1103_v38, %v93_v49 }
  0x87   :  { %v800_v50 = vsel %vm199_vm5, 1.0, %v976_v41  ;;  %v784_v51 = vsel %vm183_vm6, 1.0, %v976_v41 }
  0x88   :  { %893 = vmatprep.mubr.msk.f32.mxu0 %vm313_vm0, %v784_v51  ;;  %917 = vmatprep.mubr.msk.f32.mxu1 %vm313_vm0, %v800_v50 }
  0x89   :  { %v144_v52 = vpop.permute.xlu1 %143  ;;  %v96_v53 = vpop.permute.xlu0 %95 }
  0x8a   :  { %vm200_vm7 = vcmp.eq.s32.totalorder %v1103_v38, %v144_v52  ;;  %vm184_vm8 = vcmp.eq.s32.totalorder %v1103_v38, %v96_v53 }
  0x8b   :  { %v801_v54 = vsel %vm200_vm7, 1.0, %v976_v41  ;;  %v785_v55 = vsel %vm184_vm8, 1.0, %v976_v41 }
  0x8c   :  { %894 = vmatmul.mubr.msk.f32.gmra.mxu0 %vm313_vm0, %v785_v55  ;;  %918 = vmatmul.mubr.msk.f32.gmra.mxu1 %vm313_vm0, %v801_v54 }
  0x8d   :  { %v147_v56 = vpop.permute.xlu1 %146  ;;  %v99_v57 = vpop.permute.xlu0 %98 }
  0x8e   :  { %vm201_vm9 = vcmp.eq.s32.totalorder %v1103_v38, %v147_v56  ;;  %vm185_vm10 = vcmp.eq.s32.totalorder %v1103_v38, %v99_v57 }
  0x8f   :  { %v802_v58 = vsel %vm201_vm9, 1.0, %v976_v41  ;;  %v786_v59 = vsel %vm185_vm10, 1.0, %v976_v41 }
  0x90   :  { %896 = vmatprep.mubr.msk.f32.mxu0 %vm313_vm0, %v786_v59  ;;  %920 = vmatprep.mubr.msk.f32.mxu1 %vm313_vm0, %v802_v58 }
  0x91   :  { %v150_v60 = vpop.permute.xlu1 %149  ;;  %v102_v61 = vpop.permute.xlu0 %101 }
  0x92   :  { %vm202_vm11 = vcmp.eq.s32.totalorder %v1103_v38, %v150_v60  ;;  %vm186_vm12 = vcmp.eq.s32.totalorder %v1103_v38, %v102_v61 }
  0x93   :  { %v803_v62 = vsel %vm202_vm11, 1.0, %v976_v41  ;;  %v787_v63 = vsel %vm186_vm12, 1.0, %v976_v41 }
  0x94   :  { %897 = vmatmul.mubr.msk.f32.gmra.mxu0 %vm313_vm0, %v787_v63  ;;  %921 = vmatmul.mubr.msk.f32.gmra.mxu1 %vm313_vm0, %v803_v62 }
  0x95   :  { %v153_v0 = vpop.permute.xlu1 %152  ;;  %v105_v1 = vpop.permute.xlu0 %104 }
  0x96   :  { %vm203_vm13 = vcmp.eq.s32.totalorder %v1103_v38, %v153_v0  ;;  %vm187_vm14 = vcmp.eq.s32.totalorder %v1103_v38, %v105_v1 }
  0x97   :  { %v804_v2 = vsel %vm203_vm13, 1.0, %v976_v41  ;;  %v788_v3 = vsel %vm187_vm14, 1.0, %v976_v41 }
  0x98   :  { %899 = vmatprep.mubr.msk.f32.mxu0 %vm313_vm0, %v788_v3  ;;  %923 = vmatprep.mubr.msk.f32.mxu1 %vm313_vm0, %v804_v2 }
  0x99   :  { %v156_v4 = vpop.permute.xlu1 %155  ;;  %v108_v5 = vpop.permute.xlu0 %107 }
  0x9a   :  { %vm204_vm15 = vcmp.eq.s32.totalorder %v1103_v38, %v156_v4  ;;  %vm188_vm1 = vcmp.eq.s32.totalorder %v1103_v38, %v108_v5 }
  0x9b   :  { %v805_v6 = vsel %vm204_vm15, 1.0, %v976_v41  ;;  %v789_v7 = vsel %vm188_vm1, 1.0, %v976_v41 }
  0x9c   :  { %900 = vmatmul.mubr.msk.f32.gmra.mxu0 %vm313_vm0, %v789_v7  ;;  %924 = vmatmul.mubr.msk.f32.gmra.mxu1 %vm313_vm0, %v805_v6 }
  0x9d   :  { %v159_v8 = vpop.permute.xlu1 %158  ;;  %v111_v9 = vpop.permute.xlu0 %110 }
  0x9e   :  { %vm205_vm2 = vcmp.eq.s32.totalorder %v1103_v38, %v159_v8  ;;  %vm189_vm3 = vcmp.eq.s32.totalorder %v1103_v38, %v111_v9 }
  0x9f   :  { %v806_v10 = vsel %vm205_vm2, 1.0, %v976_v41  ;;  %v790_v11 = vsel %vm189_vm3, 1.0, %v976_v41 }
  0xa0   :  { %902 = vmatprep.mubr.msk.f32.mxu0 %vm313_vm0, %v790_v11  ;;  %926 = vmatprep.mubr.msk.f32.mxu1 %vm313_vm0, %v806_v10 }
  0xa1   :  { %v162_v12 = vpop.permute.xlu1 %161  ;;  %v114_v13 = vpop.permute.xlu0 %113 }
  0xa2   :  { %vm206_vm4 = vcmp.eq.s32.totalorder %v1103_v38, %v162_v12  ;;  %vm190_vm5 = vcmp.eq.s32.totalorder %v1103_v38, %v114_v13 }
  0xa3   :  { %v807_v14 = vsel %vm206_vm4, 1.0, %v976_v41  ;;  %v791_v15 = vsel %vm190_vm5, 1.0, %v976_v41 }
  0xa4   :  { %903 = vmatmul.mubr.msk.f32.gmra.mxu0 %vm313_vm0, %v791_v15  ;;  %927 = vmatmul.mubr.msk.f32.gmra.mxu1 %vm313_vm0, %v807_v14 }
  0xa5   :  { %v165_v16 = vpop.permute.xlu1 %164  ;;  %v117_v17 = vpop.permute.xlu0 %116 }
  0xa6   :  { %vm207_vm6 = vcmp.eq.s32.totalorder %v1103_v38, %v165_v16  ;;  %vm191_vm7 = vcmp.eq.s32.totalorder %v1103_v38, %v117_v17 }
  0xa7   :  { %v808_v18 = vsel %vm207_vm6, 1.0, %v976_v41  ;;  %v792_v19 = vsel %vm191_vm7, 1.0, %v976_v41 }
  0xa8   :  { %905 = vmatprep.mubr.msk.f32.mxu0 %vm313_vm0, %v792_v19  ;;  %929 = vmatprep.mubr.msk.f32.mxu1 %vm313_vm0, %v808_v18 }
  0xa9   :  { %v168_v20 = vpop.permute.xlu1 %167  ;;  %v120_v21 = vpop.permute.xlu0 %119 }
  0xaa   :  { %vm208_vm8 = vcmp.eq.s32.totalorder %v1103_v38, %v168_v20  ;;  %vm192_vm9 = vcmp.eq.s32.totalorder %v1103_v38, %v120_v21 }
  0xab   :  { %v809_v22 = vsel %vm208_vm8, 1.0, %v976_v41  ;;  %v793_v23 = vsel %vm192_vm9, 1.0, %v976_v41 }
  0xac   :  { %906 = vmatmul.mubr.msk.f32.gmra.mxu0 %vm313_vm0, %v793_v23  ;;  %930 = vmatmul.mubr.msk.f32.gmra.mxu1 %vm313_vm0, %v809_v22 }
  0xad   :  { %v171_v24 = vpop.permute.xlu1 %170  ;;  %v123_v25 = vpop.permute.xlu0 %122 }
  0xae   :  { %vm209_vm10 = vcmp.eq.s32.totalorder %v1103_v38, %v171_v24  ;;  %vm193_vm11 = vcmp.eq.s32.totalorder %v1103_v38, %v123_v25 }
  0xaf   :  { %v810_v26 = vsel %vm209_vm10, 1.0, %v976_v41  ;;  %v794_v27 = vsel %vm193_vm11, 1.0, %v976_v41 }
  0xb0   :  { %908 = vmatprep.mubr.msk.f32.mxu0 %vm313_vm0, %v794_v27  ;;  %932 = vmatprep.mubr.msk.f32.mxu1 %vm313_vm0, %v810_v26 }
  0xb1   :  { %v174_v28 = vpop.permute.xlu1 %173  ;;  %v126_v29 = vpop.permute.xlu0 %125 }
  0xb2   :  { %vm210_vm12 = vcmp.eq.s32.totalorder %v1103_v38, %v174_v28  ;;  %vm194_vm13 = vcmp.eq.s32.totalorder %v1103_v38, %v126_v29 }
  0xb3   :  { %v811_v30 = vsel %vm210_vm12, 1.0, %v976_v41  ;;  %v795_v31 = vsel %vm194_vm13, 1.0, %v976_v41 }
  0xb4   :  { %909 = vmatmul.mubr.msk.f32.gmra.mxu0 %vm313_vm0, %v795_v31  ;;  %933 = vmatmul.mubr.msk.f32.gmra.mxu1 %vm313_vm0, %v811_v30 }
  0xb5   :  { %v177_v32 = vpop.permute.xlu1 %176  ;;  %v129_v33 = vpop.permute.xlu0 %128 }
  0xb6   :  { %vm211_vm14 = vcmp.eq.s32.totalorder %v1103_v38, %v177_v32  ;;  %vm195_vm15 = vcmp.eq.s32.totalorder %v1103_v38, %v129_v33 }
  0xb7   :  { %v812_v34 = vsel %vm211_vm14, 1.0, %v976_v41  ;;  %v796_v35 = vsel %vm195_vm15, 1.0, %v976_v41 }
  0xb8   :  { %911 = vmatprep.mubr.msk.f32.mxu0 %vm313_vm0, %v796_v35  ;;  %935 = vmatprep.mubr.msk.f32.mxu1 %vm313_vm0, %v812_v34 }
  0xb9   :  { %v180_v36 = vpop.permute.xlu1 %179  ;;  %v132_v37 = vpop.permute.xlu0 %131 }
  0xba   :  { %vm212_vm1 = vcmp.eq.s32.totalorder %v1103_v38, %v180_v36  ;;  %vm196_vm2 = vcmp.eq.s32.totalorder %v1103_v38, %v132_v37 }
  0xbb   :  { %v813_v39 = vsel %vm212_vm1, 1.0, %v976_v41  ;;  %v797_v40 = vsel %vm196_vm2, 1.0, %v976_v41 }
  0xbc   :  { %912 = vmatmul.mubr.msk.f32.gmra.mxu0 %vm313_vm0, %v797_v40  ;;  %936 = vmatmul.mubr.msk.f32.gmra.mxu1 %vm313_vm0, %v813_v39 }
 0x141   :  { %v892_v42 = vpop.f32.mrf.mxu0 }
 0x142   :  { %735 = vst [vmem:[#allocation3 + $0x8] sm:$0xff] %v892_v42 }
 0x143   :  { %v476_v43 = vpop.f32.mrf.mxu0 }
 0x144   :  { %734 = vst [vmem:[#allocation3] sm:$0xff] %v476_v43 }
 0x145   :  { %v916_v44 = vpop.f32.mrf.mxu1 }
 0x146   :  { %751 = vst [vmem:[#allocation3 + $0x88] sm:$0xff] %v916_v44 }
 0x147   :  { %v556_v45 = vpop.f32.mrf.mxu1 }
 0x148   :  { %750 = vst [vmem:[#allocation3 + $0x80] sm:$0xff] %v556_v45 }
 0x14c   :  { %v895_v46 = vpop.f32.mrf.mxu0  ;;  %v919_v47 = vpop.f32.mrf.mxu1 }
 0x14d   :  { %737 = vst [vmem:[#allocation3 + $0x18] sm:$0xff] %v895_v46  ;;  %753 = vst [vmem:[#allocation3 + $0x98] sm:$0xff] %v919_v47 }
 0x14e   :  { %v486_v38 = vpop.f32.mrf.mxu0  ;;  %v566_v48 = vpop.f32.mrf.mxu1 }
 0x14f   :  { %736 = vst [vmem:[#allocation3 + $0x10] sm:$0xff] %v486_v38  ;;  %752 = vst [vmem:[#allocation3 + $0x90] sm:$0xff] %v566_v48 }
 0x154   :  { %v898_v41 = vpop.f32.mrf.mxu0  ;;  %v922_v49 = vpop.f32.mrf.mxu1 }
 0x155   :  { %739 = vst [vmem:[#allocation3 + $0x28] sm:$0xff] %v898_v41  ;;  %755 = vst [vmem:[#allocation3 + $0xa8] sm:$0xff] %v922_v49 }
 0x156   :  { %v496_v50 = vpop.f32.mrf.mxu0  ;;  %v576_v51 = vpop.f32.mrf.mxu1 }
 0x157   :  { %738 = vst [vmem:[#allocation3 + $0x20] sm:$0xff] %v496_v50  ;;  %754 = vst [vmem:[#allocation3 + $0xa0] sm:$0xff] %v576_v51 }
 0x15c   :  { %v901_v52 = vpop.f32.mrf.mxu0  ;;  %v925_v53 = vpop.f32.mrf.mxu1 }
 0x15d   :  { %741 = vst [vmem:[#allocation3 + $0x38] sm:$0xff] %v901_v52  ;;  %757 = vst [vmem:[#allocation3 + $0xb8] sm:$0xff] %v925_v53 }
 0x15e   :  { %v506_v54 = vpop.f32.mrf.mxu0  ;;  %v586_v55 = vpop.f32.mrf.mxu1 }
 0x15f   :  { %740 = vst [vmem:[#allocation3 + $0x30] sm:$0xff] %v506_v54  ;;  %756 = vst [vmem:[#allocation3 + $0xb0] sm:$0xff] %v586_v55 }
 0x164   :  { %v904_v56 = vpop.f32.mrf.mxu0  ;;  %v928_v57 = vpop.f32.mrf.mxu1 }
 0x165   :  { %743 = vst [vmem:[#allocation3 + $0x48] sm:$0xff] %v904_v56  ;;  %759 = vst [vmem:[#allocation3 + $0xc8] sm:$0xff] %v928_v57 }
 0x166   :  { %v516_v58 = vpop.f32.mrf.mxu0  ;;  %v596_v59 = vpop.f32.mrf.mxu1 }
 0x167   :  { %742 = vst [vmem:[#allocation3 + $0x40] sm:$0xff] %v516_v58  ;;  %758 = vst [vmem:[#allocation3 + $0xc0] sm:$0xff] %v596_v59 }
 0x16c   :  { %v907_v60 = vpop.f32.mrf.mxu0  ;;  %v931_v61 = vpop.f32.mrf.mxu1 }
 0x16d   :  { %745 = vst [vmem:[#allocation3 + $0x58] sm:$0xff] %v907_v60  ;;  %761 = vst [vmem:[#allocation3 + $0xd8] sm:$0xff] %v931_v61 }
 0x16e   :  { %v526_v62 = vpop.f32.mrf.mxu0  ;;  %v606_v63 = vpop.f32.mrf.mxu1 }
 0x16f   :  { %744 = vst [vmem:[#allocation3 + $0x50] sm:$0xff] %v526_v62  ;;  %760 = vst [vmem:[#allocation3 + $0xd0] sm:$0xff] %v606_v63 }
 0x174   :  { %v910_v0 = vpop.f32.mrf.mxu0  ;;  %v934_v1 = vpop.f32.mrf.mxu1 }
 0x175   :  { %747 = vst [vmem:[#allocation3 + $0x68] sm:$0xff] %v910_v0  ;;  %763 = vst [vmem:[#allocation3 + $0xe8] sm:$0xff] %v934_v1 }
 0x176   :  { %v536_v2 = vpop.f32.mrf.mxu0  ;;  %v616_v3 = vpop.f32.mrf.mxu1 }
 0x177   :  { %746 = vst [vmem:[#allocation3 + $0x60] sm:$0xff] %v536_v2  ;;  %762 = vst [vmem:[#allocation3 + $0xe0] sm:$0xff] %v616_v3 }
 0x17c   :  { %v913_v4 = vpop.f32.mrf.mxu0  ;;  %v937_v5 = vpop.f32.mrf.mxu1 }
 0x17d   :  { %749 = vst [vmem:[#allocation3 + $0x78] sm:$0xff] %v913_v4  ;;  %765 = vst [vmem:[#allocation3 + $0xf8] sm:$0xff] %v937_v5 }
 0x17e   :  { %v546_v6 = vpop.f32.mrf.mxu0  ;;  %v626_v7 = vpop.f32.mrf.mxu1 }
 0x17f   :  { %748 = vst [vmem:[#allocation3 + $0x70] sm:$0xff] %v546_v6  ;;  %764 = vst [vmem:[#allocation3 + $0xf0] sm:$0xff] %v626_v7 }
 0x180   :  { %964 = shalt.err (!%p961_p4)
}
 0x181   :  { %s978_s25 = smov 128   ;;  %s979_s26 = smov 8  }
 0x182   :  { %777 = dma.vmem_to_hbm [thread:$0]  %s772_s23, 4096, %s1206_s2, [#allocation4], %s978_s25, %s978_s25, %s979_s26  }
 0x183   :  { %973 = dma.done.wait [#allocation4], 4096  }
 0x184   :  { %974 = vsyncadd [#allocation4], 4294963200 }
 0x185   :  { %781 = vsyncpa [#allocation4], 1 }

</bundles_post_ra>
